<compile_context>
chip_gen: v7x
topology: tpu7x:2x2x1
jax: 0.10.0
libtpu: 0.0.40
codegen_flags: <defaults>
</compile_context>

<pallas_src>
import jax
import jax.numpy as jnp
from jax.experimental import pallas as pl
from jax.experimental.pallas import tpu as pltpu


def logreg_kernel(x_ref, wt_ref, b_ref, o_ref):
    # x_ref: (TB, D), wt_ref: (D, C-1), b_ref: (1, C-1), o_ref: (TB, C)
    x = x_ref[...]
    wt = wt_ref[...]
    b = b_ref[...]

    # Linear layer: z = x @ W^T + b, with W already stored transposed -> (TB, C-1)
    z = jnp.dot(x, wt, preferred_element_type=jnp.float32) + b

    # softmax over hstack([ones(TB,1), z]) without materializing the concat of
    # logits: column 0 is a fixed logit of 1.0 folded into the reduction.
    m = jnp.maximum(jnp.max(z, axis=1, keepdims=True), 1.0)   # (TB, 1)
    e_one = jnp.exp(1.0 - m)                                  # (TB, 1)
    e_z = jnp.exp(z - m)                                      # (TB, C-1)
    denom = e_one + jnp.sum(e_z, axis=1, keepdims=True)       # (TB, 1)

    # EUP reciprocal + one Newton-Raphson step (keeps f32 accuracy, frees VALU).
    inv = pl.reciprocal(denom, approx=True)
    inv = inv * (2.0 - denom * inv)

    # Build the full (TB, C) probability tile and emit ONE store.
    probs = jnp.concatenate([e_one * inv, e_z * inv], axis=1)  # (TB, C)
    o_ref[...] = probs.astype(o_ref.dtype)


def logreg_forward(x, w, b, *, block_b=512):
    """Pallas forward for LogReg.

    x: (B, D) f32, w: (C-1, D) f32 (nn.Linear layout), b: (C-1,) f32.
    Returns (B, C) softmax probabilities, matching the PyTorch module.
    """
    B, D = x.shape
    Cm1 = w.shape[0]
    C = Cm1 + 1

    # Free layout plumbing in the wrapper: store weight as (D, C-1).
    wt = jnp.asarray(w, jnp.float32).T
    b2d = jnp.asarray(b, jnp.float32).reshape(1, Cm1)

    # Batch tile: big enough to amortize grid overhead, multiple of 8 sublanes
    # (or the full batch when B is small).
    tb = min(block_b, B)
    pad = (-B) % tb
    x_in = jnp.pad(x, ((0, pad), (0, 0))) if pad else x
    bp = B + pad
    grid = (bp // tb,)

    out = pl.pallas_call(
        logreg_kernel,
        out_shape=jax.ShapeDtypeStruct((bp, C), jnp.float32),
        grid=grid,
        in_specs=[
            pl.BlockSpec((tb, D), lambda i: (i, 0)),     # x: tiled over batch
            pl.BlockSpec((D, Cm1), lambda i: (0, 0)),    # w^T: VMEM-resident
            pl.BlockSpec((1, Cm1), lambda i: (0, 0)),    # bias: VMEM-resident
        ],
        out_specs=pl.BlockSpec((tb, C), lambda i: (i, 0)),
        compiler_params=pltpu.CompilerParams(
            dimension_semantics=("parallel",),           # v7x: shard over 2 TCs
        ),
    )(x_in, wt, b2d)

    return out[:B] if pad else out


def logreg_reference(x, w, b):
    logits = x @ w.T + b
    logits = jnp.concatenate(
        [jnp.ones((x.shape[0], 1), jnp.float32), logits], axis=1
    )
    return jax.nn.softmax(logits, axis=1)


if __name__ == "__main__":
    # Small shapes consistent with the module's forward.
    batch = 8
    input_size = 32
    num_classes = 5

    key = jax.random.PRNGKey(0)
    kx, kw, kb = jax.random.split(key, 3)

    x = jax.random.normal(kx, (batch, input_size), dtype=jnp.float32)

    # Deterministic parameter init mimicking nn.Linear (uniform in +-1/sqrt(fan_in)).
    bound = 1.0 / jnp.sqrt(jnp.float32(input_size))
    w = jax.random.uniform(
        kw, (num_classes - 1, input_size), jnp.float32, -bound, bound
    )
    b = jax.random.uniform(kb, (num_classes - 1,), jnp.float32, -bound, bound)

    out = logreg_forward(x, w, b)
    jax.block_until_ready(out)

    ref = logreg_reference(x, w, b)
    assert out.shape == (batch, num_classes)
    assert jnp.allclose(out, ref, atol=1e-5, rtol=1e-5)
    assert jnp.allclose(jnp.sum(out, axis=1), jnp.ones((batch,)), atol=1e-5)

    print("KERNEL_OK")
</pallas_src>

<mosaic_0001>
module attributes {stable_mosaic.version = 11 : i64} {
  func.func @logreg_kernel(%arg0: i32, %arg1: memref<8x32xf32, #tpu.memory_space<vmem>>, %arg2: memref<32x4xf32, #tpu.memory_space<vmem>>, %arg3: memref<1x4xf32, #tpu.memory_space<vmem>>, %arg4: memref<8x5xf32, #tpu.memory_space<vmem>>) attributes {dimension_semantics = [#tpu.dimension_semantics<parallel>], iteration_bounds = array<i64: 1>, scalar_prefetch = 0 : i64, scratch_operands = 0 : i64, tpu.core_type = #tpu.core_type<tc>, window_params = [{transform_indices = @transform_0, window_bounds = array<i64: 8, 32>}, {pipeline_mode = #tpu.pipeline_mode<synchronous>, transform_indices = @transform_1, window_bounds = array<i64: 32, 4>}, {pipeline_mode = #tpu.pipeline_mode<synchronous>, transform_indices = @transform_2, window_bounds = array<i64: 1, 4>}, {transform_indices = @transform_3, window_bounds = array<i64: 8, 5>}]} {
    %c0 = arith.constant 0 : index
    %c0_0 = arith.constant 0 : index
    %0 = vector.load %arg1[%c0, %c0_0] : memref<8x32xf32, #tpu.memory_space<vmem>>, vector<8x32xf32>
    %c0_1 = arith.constant 0 : index
    %c0_2 = arith.constant 0 : index
    %1 = vector.load %arg2[%c0_1, %c0_2] : memref<32x4xf32, #tpu.memory_space<vmem>>, vector<32x4xf32>
    %c0_3 = arith.constant 0 : index
    %c0_4 = arith.constant 0 : index
    %2 = vector.load %arg3[%c0_3, %c0_4] : memref<1x4xf32, #tpu.memory_space<vmem>>, vector<1x4xf32>
    %cst = arith.constant dense<0.000000e+00> : vector<8x4xf32>
    %3 = tpu.matmul %0, %1, %cst {dimension_numbers = #tpu.dot_dimension_numbers<[1], [0], [0], [1], [0, 0, 1, 1], [], []>} : vector<8x32xf32>, vector<32x4xf32>, vector<8x4xf32> -> vector<8x4xf32>
    %4 = vector.broadcast %2 : vector<1x4xf32> to vector<8x4xf32>
    %5 = arith.addf %3, %4 : vector<8x4xf32>
    %cst_5 = arith.constant dense<0xFF800000> : vector<8xf32>
    %6 = vector.multi_reduction <maximumf>, %5, %cst_5 [1] : vector<8x4xf32> to vector<8xf32>
    %7 = vector.shape_cast %6 : vector<8xf32> to vector<8x1xf32>
    %cst_6 = arith.constant 1.000000e+00 : f32
    %8 = vector.broadcast %cst_6 : f32 to vector<8x1xf32>
    %9 = arith.maximumf %7, %8 : vector<8x1xf32>
    %cst_7 = arith.constant 1.000000e+00 : f32
    %10 = vector.broadcast %cst_7 : f32 to vector<8x1xf32>
    %11 = arith.subf %10, %9 : vector<8x1xf32>
    %12 = math.exp %11 : vector<8x1xf32>
    %13 = vector.broadcast %9 : vector<8x1xf32> to vector<8x4xf32>
    %14 = arith.subf %5, %13 : vector<8x4xf32>
    %15 = math.exp %14 : vector<8x4xf32>
    %cst_8 = arith.constant dense<0.000000e+00> : vector<8xf32>
    %16 = vector.multi_reduction <add>, %15, %cst_8 [1] : vector<8x4xf32> to vector<8xf32>
    %17 = vector.shape_cast %16 : vector<8xf32> to vector<8x1xf32>
    %18 = arith.addf %12, %17 : vector<8x1xf32>
    %19 = tpu.reciprocal %18 {approx = true} : vector<8x1xf32> -> vector<8x1xf32>
    %20 = arith.mulf %18, %19 : vector<8x1xf32>
    %cst_9 = arith.constant 2.000000e+00 : f32
    %21 = vector.broadcast %cst_9 : f32 to vector<8x1xf32>
    %22 = arith.subf %21, %20 : vector<8x1xf32>
    %23 = arith.mulf %19, %22 : vector<8x1xf32>
    %24 = arith.mulf %12, %23 : vector<8x1xf32>
    %25 = vector.broadcast %23 : vector<8x1xf32> to vector<8x4xf32>
    %26 = arith.mulf %15, %25 : vector<8x4xf32>
    %27 = tpu.concatenate %24, %26 in 1 : vector<8x1xf32>, vector<8x4xf32> -> vector<8x5xf32>
    %c0_10 = arith.constant 0 : index
    %c0_11 = arith.constant 0 : index
    %28 = vector.load %arg4[%c0_10, %c0_11] : memref<8x5xf32, #tpu.memory_space<vmem>>, vector<8x5xf32>
    tpu.vector_store %arg4[%c0_10, %c0_11], %27 {strides = array<i32>} : memref<8x5xf32, #tpu.memory_space<vmem>>, vector<8x5xf32>,
    return
  }
  func.func @transform_0(%arg0: i32) -> (i32, i32) {
    %c0_i32 = arith.constant 0 : i32
    %c0_i32_0 = arith.constant 0 : i32
    return %arg0, %c0_i32 : i32, i32
  }
  func.func @transform_1(%arg0: i32) -> (i32, i32) {
    %c0_i32 = arith.constant 0 : i32
    %c0_i32_0 = arith.constant 0 : i32
    %c0_i32_1 = arith.constant 0 : i32
    return %c0_i32, %c0_i32_0 : i32, i32
  }
  func.func @transform_2(%arg0: i32) -> (i32, i32) {
    %c0_i32 = arith.constant 0 : i32
    %c0_i32_0 = arith.constant 0 : i32
    %c0_i32_1 = arith.constant 0 : i32
    return %c0_i32, %c0_i32_0 : i32, i32
  }
  func.func @transform_3(%arg0: i32) -> (i32, i32) {
    %c0_i32 = arith.constant 0 : i32
    %c0_i32_0 = arith.constant 0 : i32
    return %arg0, %c0_i32 : i32, i32
  }
}

</mosaic_0001>

<bundles_post_ra>
// kernel: tpu_custom_call.1
= control target key start
LH: loop header
LB: loop body
LE: loop exit
PB: predicated region body
PF: predicated region fallthrough
CT: control target
= control target key end

     0   :  { %v203_v3 = vmov 0.0|0.0   ;;  %vm204_vm0 = vmmov 0   ;;  %v205_v6 = vmov 0.0   ;;  %s258_s0 = inlined_call_operand.vmem [shape: f32[8,32], index: 0, kind: input, shape index: {}]   ;;  %s259_s1 = inlined_call_operand.vmem [shape: f32[32,4], index: 1, kind: input, shape index: {}]   ;;  %s260_s2 = inlined_call_operand.vmem [shape: f32[1,4], index: 2, kind: input, shape index: {}]   ;;  %s261_s3 = inlined_call_operand.hbm [shape: f32[8,5], index: 3, kind: output, shape index: {}]  }
   0x1   :  { %v16_v0 = vld [vmem:[%s259_s1] sm:$0xff]  ;;  %v17_v1 = vld [vmem:[%s259_s1 + $0x8] sm:$0xff]  ;;  %v18_v2 = vld [vmem:[%s259_s1 + $0x10] sm:$0xff]  ;;  %162 = vmatprep.subr.bf16.mxu0 %v203_v3  ;;  %159 = vmatprep.mubr.msk.f32.mxu0 %vm204_vm0, %v205_v6 }
   0x2   :  { %v163_v4 = vpack.c.bf16 %v17_v1, %v16_v0  ;;  %v19_v5 = vld [vmem:[%s259_s1 + $0x18] sm:$0xff] }
   0x3   :  { %8 = vsyncpa [#allocation3], 0  ;;  %v166_v7 = vpack.c.bf16 %v19_v5, %v18_v2  ;;  %v15_v8 = vld [vmem:[%s258_s0] sm:$0xff]  ;;  %vm27_vm1 = vcmask 261120   ;;  %vm101_vm2 = vcmask 31744   ;;  %s206_s0 = smov 1  }
   0x4   :  { %164 = vmatpush3.bf16.msra.mxu0 %v163_v4  ;;  %v144_v9 = vld [vmem:[%s260_s2] ss:$0 sm:$0xff]  ;;  %s207_s1 = smov [#allocation2]   ;;  %vm126_vm3 = vcmask 7168   ;;  %vm128_vm4 = vcmask 39936  }
   0x5   :  { %165 = vmatprep.subr.bf16.mxu0 %v203_v3  ;;  %s136_s2 = sshll.u32 %s207_s1, 4  ;;  %s137_s2 = int_to_ptr.vmem [resolvable:$true] %s136_s2 }
   0x6   :  { %s179_s24 = scalar_lea.vmem %s137_s2, 128  ;;  %p184_p1 = scmp.lt.s32.totalorder %s137_s2, %s137_s2 }
   0x7   :  { %p180_p0 = scmp.ne.s32.totalorder %s137_s2, %s179_s24  ;;  %p185_p2 = scmp.lt.s32.totalorder %s179_s24, %s179_s24 }
   0x8   :  { %167 = vmatpush3.bf16.msra.mxu0 %v166_v7 }
   0x9   :  { %p186_p3 = por %p185_p2, %p184_p1 }
   0xb   :  { %160 = vmatmul.mubr.msk.f32.vlgmr.msra.gmra.mrb[0].mxu0 %vm27_vm1, %v15_v8  ;;  %p187_p4 = pnand %p186_p3, %p180_p0 }
  0xde   :  { %v97_v10 = vpop.f32.mrb[0].mxu0 }
  0xdf   :  { %v98_v11 = vadd.f32 %v144_v9, %v97_v10  ;;  %v161_v12 = vpop.f32.mrb[1].mxu0 }
  0xe1   :  { %v102_v13 = vsel %vm101_vm2, %v98_v11, -inf }
  0xe2   :  { %103 = vmax.xlane.f32.xlu0 %v102_v13 }
 0x16f   :  { %v104_v14 = vpop.xlane.xlu0 %103 }
 0x170   :  { %v105_v15 = vmax.f32 %v104_v14, 1.0 }
 0x172   :  { %v109_v16 = vsub.f32 %v98_v11, %v105_v15  ;;  %v106_v20 = vsub.f32 1.0, %v105_v15 }
 0x174   :  { %v110_v17 = vmul.f32 1.442695, %v109_v16  ;;  %v107_v21 = vmul.f32 1.442695, %v106_v20 }
 0x176   :  { %173 = vpow2.f32 %v110_v17 }
 0x177   :  { %175 = vpow2.f32 %v107_v21 }
 0x180   :  { %v174_v18 = vpop.eup %173 }
 0x181   :  { %v112_v19 = vsel %vm101_vm2, %v174_v18, 0.0  ;;  %v176_v22 = vpop.eup %175 }
 0x182   :  { %113 = vadd.xlane.f32.xlu0 %v112_v19 }
 0x20f   :  { %v114_v23 = vpop.xlane.xlu0 %113 }
 0x210   :  { %v115_v24 = vadd.f32 %v176_v22, %v114_v23 }
 0x212   :  { %177 = vrcp.f32 %v115_v24 }
 0x21c   :  { %v178_v25 = vpop.eup %177 }
 0x21d   :  { %v117_v26 = vmul.f32 %v178_v25, %v115_v24 }
 0x21f   :  { %v118_v27 = vsub.f32 2.0, %v117_v26 }
 0x221   :  { %v119_v28 = vmul.f32 %v178_v25, %v118_v27 }
 0x223   :  { %v121_v29 = vmul.f32 %v174_v18, %v119_v28  ;;  %v120_v30 = vmul.f32 %v176_v22, %v119_v28 }
 0x225   :  { %123 = vrot.lane.b32.xlu1 %v121_v29, %s206_s0 }
 0x297   :  { %v124_v31 = vpop.permute.xlu1 %123 }
 0x298   :  { %v127_v32 = vsel %vm126_vm3, %v120_v30, %v124_v31 }
 0x299   :  { %129 = vst.msk [vmem:[#allocation2] sm:$0xff] %vm128_vm4, %v127_v32 }
 0x29a   :  { %190 = shalt.err (!%p187_p4)
}
 0x29b   :  { %s191_s27 = scalar_lea.hbm %s261_s3, 128 }
 0x29c   :  { %p192_p5 = scmp.ne.s32.totalorder %s261_s3, %s191_s27  ;;  %p195_p6 = scmp.lt.u32.totalorder %s191_s27, %s261_s3 }
 0x29e   :  { %p197_p7 = pnand %p195_p6, %p192_p5 }
 0x2a0   :  { %200 = shalt.err (!%p197_p7)
}
 0x2a1   :  { %139 = dma.vmem_to_hbm [thread:$0]  %s137_s2, 128, %s261_s3, [#allocation3]  }
 0x2a2   :  { %201 = dma.done.wait [#allocation3], 128  }
 0x2a3   :  { %202 = vsyncadd [#allocation3], 4294967168 }
 0x2a4   :  { %143 = vsyncpa [#allocation3], 1 }

</bundles_post_ra>
